<compile_context>
chip_gen: v7x
topology: tpu7x:2x2x1
jax: 0.10.0
libtpu: 0.0.40
codegen_flags: <defaults>
</compile_context>

<pallas_src>
import jax
import jax.numpy as jnp
from jax.experimental import pallas as pl
from jax.experimental.pallas import tpu as pltpu

# ---- model hyper-params (small, consistent with the module's __init__) ----
SEQ_LEN = 8
INPUT_DIM = 4
HIDDEN = 32
OUTPUT_DIM = 3
BATCH = 2
DROPOUT_P = 0.0  # TODO(synk): dropout is implemented as eval-mode identity (no RNG mask).


def attention_lstm_kernel(
    x2d_ref,      # (S*TB, input_dim)  time-major, row t*TB+b, TB = padded batch
    h0_ref,       # (TB, H)
    c0_ref,       # (TB, H)
    w_ih_ref,     # (input_dim, 4H)   g-gate columns pre-scaled by 2
    w_hh_ref,     # (H, 4H)           g-gate columns pre-scaled by 2
    b_ref,        # (1, 4H)           (b_ih + b_hh), g slice pre-scaled by 2
    w_attn_ref,   # (H, S)
    b_attn_ref,   # (1, S)
    w_out_ref,    # (H, output_dim)
    b_out_ref,    # (1, output_dim)
    scores_ref,   # out: (TB, output_dim)
    attn_w_ref,   # out: (TB, S)
):
    H = HIDDEN
    S = SEQ_LEN
    TB = h0_ref.shape[0]   # padded batch (multiple of 8)

    # ---- hoisted input projection: one matmul + one bias broadcast for all steps ----
    gates_x = (
        jnp.dot(x2d_ref[...], w_ih_ref[...], preferred_element_type=jnp.float32)
        + b_ref[...]
    )                                                    # (S*TB, 4H)

    w_hh = w_hh_ref[...]                                 # (H, 4H), loaded once
    h = h0_ref[...]                                      # (TB, H)  carried in vregs
    c = c0_ref[...]                                      # (TB, H)  carried in vregs
    hs = []                                              # encoder outputs, in registers

    # ---- fully unrolled LSTM recurrence (PyTorch gate order: i, f, g, o) ----
    # g-gate preactivation was pre-scaled by 2 in the wrapper, so tanh(x) is obtained
    # as 2*sigmoid(2x) - 1: one EUP pass (sigmoid) over the full gate vreg per step.
    for t in range(S):
        gates = gates_x[t * TB:(t + 1) * TB, :] + jnp.dot(
            h, w_hh, preferred_element_type=jnp.float32
        )                                                # (TB, 4H)
        sig = jax.nn.sigmoid(gates)                      # single EUP pass over full vreg
        i_g = sig[:, 0 * H:1 * H]
        f_g = sig[:, 1 * H:2 * H]
        g_g = 2.0 * sig[:, 2 * H:3 * H] - 1.0            # tanh via VPU fma
        o_g = sig[:, 3 * H:4 * H]
        c = f_g * c + i_g * g_g
        h = o_g * jnp.tanh(c)                            # second (unavoidable) EUP pass
        hs.append(h)

    # ---- attention: softmax(attn(h_final)) over the sequence axis ----
    logits = (
        jnp.dot(h, w_attn_ref[...], preferred_element_type=jnp.float32)
        + b_attn_ref[...]
    )                                                    # (TB, S)
    m = jnp.max(logits, axis=1, keepdims=True)
    e = jnp.exp(logits - m)
    denom = jnp.sum(e, axis=1, keepdims=True)
    # exact reciprocal (approx=True would risk the 1e-4 check vs the f32 reference)
    attn_w = e * pl.reciprocal(denom, approx=False)      # (TB, S)
    attn_w_ref[...] = attn_w.astype(attn_w_ref.dtype)

    # ---- attn_applied[b, :] = sum_s attn_w[b, s] * h_s[b, :]  (registers only) ----
    attn_applied = attn_w[:, 0:1] * hs[0]
    for s in range(1, S):
        attn_applied = attn_applied + attn_w[:, s:s + 1] * hs[s]

    scores = (
        jnp.dot(attn_applied, w_out_ref[...], preferred_element_type=jnp.float32)
        + b_out_ref[...]
    )                                                    # (TB, output_dim)
    scores_ref[...] = scores.astype(scores_ref.dtype)


def init_params(key):
    """Deterministic params matching nn.LSTM / nn.Linear default-init shapes."""
    ks = jax.random.split(key, 8)
    bound = 1.0 / jnp.sqrt(HIDDEN)
    w_ih = jax.random.uniform(ks[0], (4 * HIDDEN, INPUT_DIM), jnp.float32, -bound, bound)
    w_hh = jax.random.uniform(ks[1], (4 * HIDDEN, HIDDEN), jnp.float32, -bound, bound)
    b_ih = jax.random.uniform(ks[2], (4 * HIDDEN,), jnp.float32, -bound, bound)
    b_hh = jax.random.uniform(ks[3], (4 * HIDDEN,), jnp.float32, -bound, bound)
    w_attn = jax.random.uniform(ks[4], (SEQ_LEN, HIDDEN), jnp.float32, -bound, bound)
    b_attn = jax.random.uniform(ks[5], (SEQ_LEN,), jnp.float32, -bound, bound)
    w_out = jax.random.uniform(ks[6], (OUTPUT_DIM, HIDDEN), jnp.float32, -bound, bound)
    b_out = jax.random.uniform(ks[7], (OUTPUT_DIM,), jnp.float32, -bound, bound)
    return dict(w_ih=w_ih, w_hh=w_hh, b_ih=b_ih, b_hh=b_hh,
                w_attn=w_attn, b_attn=b_attn, w_out=w_out, b_out=b_out)


def attention_model_forward(input_seq, hidden_state, params):
    """input_seq: (S, B, input_dim); hidden_state: (h0, c0) each (1, B, H)."""
    S, B, I = input_seq.shape
    h0, c0 = hidden_state
    h0 = h0.reshape(B, HIDDEN)
    c0 = c0.reshape(B, HIDDEN)

    # ---- pad batch to a multiple of 8 (f32 sublane) so every per-step row slice is
    #      a whole aligned tile; padded rows are garbage but never mix across rows ----
    TB = max(8, ((B + 7) // 8) * 8)
    pad = TB - B
    if pad:
        input_seq = jnp.pad(input_seq, ((0, 0), (0, pad), (0, 0)))
        h0 = jnp.pad(h0, ((0, pad), (0, 0)))
        c0 = jnp.pad(c0, ((0, pad), (0, 0)))

    # glue: flatten time-major x (free reshape), pre-transpose weights so kernel does
    # x @ W, fold the two LSTM biases into one, and pre-scale the g-gate columns by 2
    # so the kernel can use the sigmoid-only gate trick (tanh(x) = 2*sigmoid(2x) - 1).
    x2d = input_seq.reshape(S * TB, I)
    g_scale = jnp.ones((1, 4 * HIDDEN), jnp.float32).at[:, 2 * HIDDEN:3 * HIDDEN].set(2.0)
    w_ih_t = params["w_ih"].T * g_scale                         # (input_dim, 4H)
    w_hh_t = params["w_hh"].T * g_scale                         # (H, 4H)
    b_lstm = (params["b_ih"] + params["b_hh"]).reshape(1, 4 * HIDDEN) * g_scale
    w_attn_t = params["w_attn"].T                               # (H, S)
    b_attn = params["b_attn"].reshape(1, SEQ_LEN)
    w_out_t = params["w_out"].T                                 # (H, output_dim)
    b_out = params["b_out"].reshape(1, OUTPUT_DIM)

    vmem = pl.BlockSpec(memory_space=pltpu.MemorySpace.VMEM)
    out_shapes = (
        jax.ShapeDtypeStruct((TB, OUTPUT_DIM), jnp.float32),  # scores (padded)
        jax.ShapeDtypeStruct((TB, SEQ_LEN), jnp.float32),     # attn_weights (padded)
    )
    scores_p, attn_p = pl.pallas_call(
        attention_lstm_kernel,
        out_shape=out_shapes,
        in_specs=[vmem] * 10,
        out_specs=(vmem, vmem),
    )(x2d, h0, c0, w_ih_t, w_hh_t, b_lstm, w_attn_t, b_attn, w_out_t, b_out)
    return scores_p[:B], attn_p[:B]


def reference_forward(input_seq, hidden_state, params):
    """Pure-JAX reference mirroring the PyTorch forward (eval mode), full f32 precision."""
    hp = jax.lax.Precision.HIGHEST
    h = hidden_state[0].reshape(BATCH, HIDDEN)
    c = hidden_state[1].reshape(BATCH, HIDDEN)
    enc = []
    for t in range(SEQ_LEN):
        gates = (jnp.dot(input_seq[t], params["w_ih"].T, precision=hp) + params["b_ih"]
                 + jnp.dot(h, params["w_hh"].T, precision=hp) + params["b_hh"])
        i_g = jax.nn.sigmoid(gates[:, :HIDDEN])
        f_g = jax.nn.sigmoid(gates[:, HIDDEN:2 * HIDDEN])
        g_g = jnp.tanh(gates[:, 2 * HIDDEN:3 * HIDDEN])
        o_g = jax.nn.sigmoid(gates[:, 3 * HIDDEN:])
        c = f_g * c + i_g * g_g
        h = o_g * jnp.tanh(c)
        enc.append(h)
    enc = jnp.stack(enc, axis=0)                                 # (S, B, H)
    logits = jnp.dot(h, params["w_attn"].T, precision=hp) + params["b_attn"]
    attn_w = jax.nn.softmax(logits, axis=1)
    attn_applied = jnp.einsum("bs,sbh->bh", attn_w, enc, precision=hp)
    scores = jnp.dot(attn_applied, params["w_out"].T, precision=hp) + params["b_out"]
    return scores, attn_w


if __name__ == "__main__":
    key = jax.random.PRNGKey(0)
    k_x, k_p = jax.random.split(key)
    x = jax.random.normal(k_x, (SEQ_LEN, BATCH, INPUT_DIM), jnp.float32)
    h0 = jnp.zeros((1, BATCH, HIDDEN), jnp.float32)
    c0 = jnp.zeros((1, BATCH, HIDDEN), jnp.float32)
    params = init_params(k_p)

    scores, attn_weights = attention_model_forward(x, (h0, c0), params)
    scores = jax.block_until_ready(scores)
    attn_weights = jax.block_until_ready(attn_weights)

    ref_scores, ref_attn = reference_forward(x, (h0, c0), params)
    assert scores.shape == (BATCH, OUTPUT_DIM)
    assert attn_weights.shape == (BATCH, SEQ_LEN)
    assert float(jnp.max(jnp.abs(scores - ref_scores))) < 1e-4
    assert float(jnp.max(jnp.abs(attn_weights - ref_attn))) < 1e-4

    print("KERNEL_OK")
</pallas_src>

<mosaic_0001>
module attributes {stable_mosaic.version = 11 : i64} {
  func.func @attention_lstm_kernel(%arg0: memref<64x4xf32, #tpu.memory_space<vmem>>, %arg1: memref<8x32xf32, #tpu.memory_space<vmem>>, %arg2: memref<8x32xf32, #tpu.memory_space<vmem>>, %arg3: memref<4x128xf32, #tpu.memory_space<vmem>>, %arg4: memref<32x128xf32, #tpu.memory_space<vmem>>, %arg5: memref<1x128xf32, #tpu.memory_space<vmem>>, %arg6: memref<32x8xf32, #tpu.memory_space<vmem>>, %arg7: memref<1x8xf32, #tpu.memory_space<vmem>>, %arg8: memref<32x3xf32, #tpu.memory_space<vmem>>, %arg9: memref<1x3xf32, #tpu.memory_space<vmem>>, %arg10: memref<8x3xf32, #tpu.memory_space<vmem>>, %arg11: memref<8x8xf32, #tpu.memory_space<vmem>>) attributes {dimension_semantics = [], scalar_prefetch = 0 : i64, scratch_operands = 0 : i64, tpu.core_type = #tpu.core_type<tc>} {
    %c0 = arith.constant 0 : index
    %c0_0 = arith.constant 0 : index
    %0 = vector.load %arg0[%c0, %c0_0] : memref<64x4xf32, #tpu.memory_space<vmem>>, vector<64x4xf32>
    %c0_1 = arith.constant 0 : index
    %c0_2 = arith.constant 0 : index
    %1 = vector.load %arg3[%c0_1, %c0_2] : memref<4x128xf32, #tpu.memory_space<vmem>>, vector<4x128xf32>
    %cst = arith.constant dense<0.000000e+00> : vector<64x128xf32>
    %2 = tpu.matmul %0, %1, %cst {dimension_numbers = #tpu.dot_dimension_numbers<[1], [0], [0], [1], [0, 0, 1, 1], [], []>} : vector<64x4xf32>, vector<4x128xf32>, vector<64x128xf32> -> vector<64x128xf32>
    %c0_3 = arith.constant 0 : index
    %c0_4 = arith.constant 0 : index
    %3 = vector.load %arg5[%c0_3, %c0_4] : memref<1x128xf32, #tpu.memory_space<vmem>>, vector<1x128xf32>
    %4 = vector.broadcast %3 : vector<1x128xf32> to vector<64x128xf32>
    %5 = arith.addf %2, %4 : vector<64x128xf32>
    %c0_5 = arith.constant 0 : index
    %c0_6 = arith.constant 0 : index
    %6 = vector.load %arg4[%c0_5, %c0_6] : memref<32x128xf32, #tpu.memory_space<vmem>>, vector<32x128xf32>
    %c0_7 = arith.constant 0 : index
    %c0_8 = arith.constant 0 : index
    %7 = vector.load %arg1[%c0_7, %c0_8] : memref<8x32xf32, #tpu.memory_space<vmem>>, vector<8x32xf32>
    %c0_9 = arith.constant 0 : index
    %c0_10 = arith.constant 0 : index
    %8 = vector.load %arg2[%c0_9, %c0_10] : memref<8x32xf32, #tpu.memory_space<vmem>>, vector<8x32xf32>
    %9 = vector.extract_strided_slice %5 {offsets = [0, 0], sizes = [8, 128], strides = [1, 1]} : vector<64x128xf32> to vector<8x128xf32>
    %cst_11 = arith.constant dense<0.000000e+00> : vector<8x128xf32>
    %10 = tpu.matmul %7, %6, %cst_11 {dimension_numbers = #tpu.dot_dimension_numbers<[1], [0], [0], [1], [0, 0, 1, 1], [], []>} : vector<8x32xf32>, vector<32x128xf32>, vector<8x128xf32> -> vector<8x128xf32>
    %11 = arith.addf %9, %10 : vector<8x128xf32>
    %12 = arith.negf %11 : vector<8x128xf32>
    %13 = math.exp %12 : vector<8x128xf32>
    %cst_12 = arith.constant 1.000000e+00 : f32
    %14 = vector.broadcast %cst_12 : f32 to vector<8x128xf32>
    %15 = arith.addf %14, %13 : vector<8x128xf32>
    %16 = arith.divf %14, %15 : vector<8x128xf32>
    %17 = vector.extract_strided_slice %16 {offsets = [0, 0], sizes = [8, 32], strides = [1, 1]} : vector<8x128xf32> to vector<8x32xf32>
    %18 = vector.extract_strided_slice %16 {offsets = [0, 32], sizes = [8, 32], strides = [1, 1]} : vector<8x128xf32> to vector<8x32xf32>
    %19 = vector.extract_strided_slice %16 {offsets = [0, 64], sizes = [8, 32], strides = [1, 1]} : vector<8x128xf32> to vector<8x32xf32>
    %cst_13 = arith.constant 2.000000e+00 : f32
    %20 = vector.broadcast %cst_13 : f32 to vector<8x32xf32>
    %21 = arith.mulf %20, %19 : vector<8x32xf32>
    %cst_14 = arith.constant 1.000000e+00 : f32
    %22 = vector.broadcast %cst_14 : f32 to vector<8x32xf32>
    %23 = arith.subf %21, %22 : vector<8x32xf32>
    %24 = vector.extract_strided_slice %16 {offsets = [0, 96], sizes = [8, 32], strides = [1, 1]} : vector<8x128xf32> to vector<8x32xf32>
    %25 = arith.mulf %18, %8 : vector<8x32xf32>
    %26 = arith.mulf %17, %23 : vector<8x32xf32>
    %27 = arith.addf %25, %26 : vector<8x32xf32>
    %28 = math.tanh %27 : vector<8x32xf32>
    %29 = arith.mulf %24, %28 : vector<8x32xf32>
    %30 = vector.extract_strided_slice %5 {offsets = [8, 0], sizes = [8, 128], strides = [1, 1]} : vector<64x128xf32> to vector<8x128xf32>
    %cst_15 = arith.constant dense<0.000000e+00> : vector<8x128xf32>
    %31 = tpu.matmul %29, %6, %cst_15 {dimension_numbers = #tpu.dot_dimension_numbers<[1], [0], [0], [1], [0, 0, 1, 1], [], []>} : vector<8x32xf32>, vector<32x128xf32>, vector<8x128xf32> -> vector<8x128xf32>
    %32 = arith.addf %30, %31 : vector<8x128xf32>
    %33 = arith.negf %32 : vector<8x128xf32>
    %34 = math.exp %33 : vector<8x128xf32>
    %cst_16 = arith.constant 1.000000e+00 : f32
    %35 = vector.broadcast %cst_16 : f32 to vector<8x128xf32>
    %36 = arith.addf %35, %34 : vector<8x128xf32>
    %37 = arith.divf %35, %36 : vector<8x128xf32>
    %38 = vector.extract_strided_slice %37 {offsets = [0, 0], sizes = [8, 32], strides = [1, 1]} : vector<8x128xf32> to vector<8x32xf32>
    %39 = vector.extract_strided_slice %37 {offsets = [0, 32], sizes = [8, 32], strides = [1, 1]} : vector<8x128xf32> to vector<8x32xf32>
    %40 = vector.extract_strided_slice %37 {offsets = [0, 64], sizes = [8, 32], strides = [1, 1]} : vector<8x128xf32> to vector<8x32xf32>
    %cst_17 = arith.constant 2.000000e+00 : f32
    %41 = vector.broadcast %cst_17 : f32 to vector<8x32xf32>
    %42 = arith.mulf %41, %40 : vector<8x32xf32>
    %cst_18 = arith.constant 1.000000e+00 : f32
    %43 = vector.broadcast %cst_18 : f32 to vector<8x32xf32>
    %44 = arith.subf %42, %43 : vector<8x32xf32>
    %45 = vector.extract_strided_slice %37 {offsets = [0, 96], sizes = [8, 32], strides = [1, 1]} : vector<8x128xf32> to vector<8x32xf32>
    %46 = arith.mulf %39, %27 : vector<8x32xf32>
    %47 = arith.mulf %38, %44 : vector<8x32xf32>
    %48 = arith.addf %46, %47 : vector<8x32xf32>
    %49 = math.tanh %48 : vector<8x32xf32>
    %50 = arith.mulf %45, %49 : vector<8x32xf32>
    %51 = vector.extract_strided_slice %5 {offsets = [16, 0], sizes = [8, 128], strides = [1, 1]} : vector<64x128xf32> to vector<8x128xf32>
    %cst_19 = arith.constant dense<0.000000e+00> : vector<8x128xf32>
    %52 = tpu.matmul %50, %6, %cst_19 {dimension_numbers = #tpu.dot_dimension_numbers<[1], [0], [0], [1], [0, 0, 1, 1], [], []>} : vector<8x32xf32>, vector<32x128xf32>, vector<8x128xf32> -> vector<8x128xf32>
    %53 = arith.addf %51, %52 : vector<8x128xf32>
    %54 = arith.negf %53 : vector<8x128xf32>
    %55 = math.exp %54 : vector<8x128xf32>
    %cst_20 = arith.constant 1.000000e+00 : f32
    %56 = vector.broadcast %cst_20 : f32 to vector<8x128xf32>
    %57 = arith.addf %56, %55 : vector<8x128xf32>
    %58 = arith.divf %56, %57 : vector<8x128xf32>
    %59 = vector.extract_strided_slice %58 {offsets = [0, 0], sizes = [8, 32], strides = [1, 1]} : vector<8x128xf32> to vector<8x32xf32>
    %60 = vector.extract_strided_slice %58 {offsets = [0, 32], sizes = [8, 32], strides = [1, 1]} : vector<8x128xf32> to vector<8x32xf32>
    %61 = vector.extract_strided_slice %58 {offsets = [0, 64], sizes = [8, 32], strides = [1, 1]} : vector<8x128xf32> to vector<8x32xf32>
    %cst_21 = arith.constant 2.000000e+00 : f32
    %62 = vector.broadcast %cst_21 : f32 to vector<8x32xf32>
    %63 = arith.mulf %62, %61 : vector<8x32xf32>
    %cst_22 = arith.constant 1.000000e+00 : f32
    %64 = vector.broadcast %cst_22 : f32 to vector<8x32xf32>
    %65 = arith.subf %63, %64 : vector<8x32xf32>
    %66 = vector.extract_strided_slice %58 {offsets = [0, 96], sizes = [8, 32], strides = [1, 1]} : vector<8x128xf32> to vector<8x32xf32>
    %67 = arith.mulf %60, %48 : vector<8x32xf32>
    %68 = arith.mulf %59, %65 : vector<8x32xf32>
    %69 = arith.addf %67, %68 : vector<8x32xf32>
    %70 = math.tanh %69 : vector<8x32xf32>
    %71 = arith.mulf %66, %70 : vector<8x32xf32>
    %72 = vector.extract_strided_slice %5 {offsets = [24, 0], sizes = [8, 128], strides = [1, 1]} : vector<64x128xf32> to vector<8x128xf32>
    %cst_23 = arith.constant dense<0.000000e+00> : vector<8x128xf32>
    %73 = tpu.matmul %71, %6, %cst_23 {dimension_numbers = #tpu.dot_dimension_numbers<[1], [0], [0], [1], [0, 0, 1, 1], [], []>} : vector<8x32xf32>, vector<32x128xf32>, vector<8x128xf32> -> vector<8x128xf32>
    %74 = arith.addf %72, %73 : vector<8x128xf32>
    %75 = arith.negf %74 : vector<8x128xf32>
    %76 = math.exp %75 : vector<8x128xf32>
    %cst_24 = arith.constant 1.000000e+00 : f32
    %77 = vector.broadcast %cst_24 : f32 to vector<8x128xf32>
    %78 = arith.addf %77, %76 : vector<8x128xf32>
    %79 = arith.divf %77, %78 : vector<8x128xf32>
    %80 = vector.extract_strided_slice %79 {offsets = [0, 0], sizes = [8, 32], strides = [1, 1]} : vector<8x128xf32> to vector<8x32xf32>
    %81 = vector.extract_strided_slice %79 {offsets = [0, 32], sizes = [8, 32], strides = [1, 1]} : vector<8x128xf32> to vector<8x32xf32>
    %82 = vector.extract_strided_slice %79 {offsets = [0, 64], sizes = [8, 32], strides = [1, 1]} : vector<8x128xf32> to vector<8x32xf32>
    %cst_25 = arith.constant 2.000000e+00 : f32
    %83 = vector.broadcast %cst_25 : f32 to vector<8x32xf32>
    %84 = arith.mulf %83, %82 : vector<8x32xf32>
    %cst_26 = arith.constant 1.000000e+00 : f32
    %85 = vector.broadcast %cst_26 : f32 to vector<8x32xf32>
    %86 = arith.subf %84, %85 : vector<8x32xf32>
    %87 = vector.extract_strided_slice %79 {offsets = [0, 96], sizes = [8, 32], strides = [1, 1]} : vector<8x128xf32> to vector<8x32xf32>
    %88 = arith.mulf %81, %69 : vector<8x32xf32>
    %89 = arith.mulf %80, %86 : vector<8x32xf32>
    %90 = arith.addf %88, %89 : vector<8x32xf32>
    %91 = math.tanh %90 : vector<8x32xf32>
    %92 = arith.mulf %87, %91 : vector<8x32xf32>
    %93 = vector.extract_strided_slice %5 {offsets = [32, 0], sizes = [8, 128], strides = [1, 1]} : vector<64x128xf32> to vector<8x128xf32>
    %cst_27 = arith.constant dense<0.000000e+00> : vector<8x128xf32>
    %94 = tpu.matmul %92, %6, %cst_27 {dimension_numbers = #tpu.dot_dimension_numbers<[1], [0], [0], [1], [0, 0, 1, 1], [], []>} : vector<8x32xf32>, vector<32x128xf32>, vector<8x128xf32> -> vector<8x128xf32>
    %95 = arith.addf %93, %94 : vector<8x128xf32>
    %96 = arith.negf %95 : vector<8x128xf32>
    %97 = math.exp %96 : vector<8x128xf32>
    %cst_28 = arith.constant 1.000000e+00 : f32
    %98 = vector.broadcast %cst_28 : f32 to vector<8x128xf32>
    %99 = arith.addf %98, %97 : vector<8x128xf32>
    %100 = arith.divf %98, %99 : vector<8x128xf32>
    %101 = vector.extract_strided_slice %100 {offsets = [0, 0], sizes = [8, 32], strides = [1, 1]} : vector<8x128xf32> to vector<8x32xf32>
    %102 = vector.extract_strided_slice %100 {offsets = [0, 32], sizes = [8, 32], strides = [1, 1]} : vector<8x128xf32> to vector<8x32xf32>
    %103 = vector.extract_strided_slice %100 {offsets = [0, 64], sizes = [8, 32], strides = [1, 1]} : vector<8x128xf32> to vector<8x32xf32>
    %cst_29 = arith.constant 2.000000e+00 : f32
    %104 = vector.broadcast %cst_29 : f32 to vector<8x32xf32>
    %105 = arith.mulf %104, %103 : vector<8x32xf32>
    %cst_30 = arith.constant 1.000000e+00 : f32
    %106 = vector.broadcast %cst_30 : f32 to vector<8x32xf32>
    %107 = arith.subf %105, %106 : vector<8x32xf32>
    %108 = vector.extract_strided_slice %100 {offsets = [0, 96], sizes = [8, 32], strides = [1, 1]} : vector<8x128xf32> to vector<8x32xf32>
    %109 = arith.mulf %102, %90 : vector<8x32xf32>
    %110 = arith.mulf %101, %107 : vector<8x32xf32>
    %111 = arith.addf %109, %110 : vector<8x32xf32>
    %112 = math.tanh %111 : vector<8x32xf32>
    %113 = arith.mulf %108, %112 : vector<8x32xf32>
    %114 = vector.extract_strided_slice %5 {offsets = [40, 0], sizes = [8, 128], strides = [1, 1]} : vector<64x128xf32> to vector<8x128xf32>
    %cst_31 = arith.constant dense<0.000000e+00> : vector<8x128xf32>
    %115 = tpu.matmul %113, %6, %cst_31 {dimension_numbers = #tpu.dot_dimension_numbers<[1], [0], [0], [1], [0, 0, 1, 1], [], []>} : vector<8x32xf32>, vector<32x128xf32>, vector<8x128xf32> -> vector<8x128xf32>
    %116 = arith.addf %114, %115 : vector<8x128xf32>
    %117 = arith.negf %116 : vector<8x128xf32>
    %118 = math.exp %117 : vector<8x128xf32>
    %cst_32 = arith.constant 1.000000e+00 : f32
    %119 = vector.broadcast %cst_32 : f32 to vector<8x128xf32>
    %120 = arith.addf %119, %118 : vector<8x128xf32>
    %121 = arith.divf %119, %120 : vector<8x128xf32>
    %122 = vector.extract_strided_slice %121 {offsets = [0, 0], sizes = [8, 32], strides = [1, 1]} : vector<8x128xf32> to vector<8x32xf32>
    %123 = vector.extract_strided_slice %121 {offsets = [0, 32], sizes = [8, 32], strides = [1, 1]} : vector<8x128xf32> to vector<8x32xf32>
    %124 = vector.extract_strided_slice %121 {offsets = [0, 64], sizes = [8, 32], strides = [1, 1]} : vector<8x128xf32> to vector<8x32xf32>
    %cst_33 = arith.constant 2.000000e+00 : f32
    %125 = vector.broadcast %cst_33 : f32 to vector<8x32xf32>
    %126 = arith.mulf %125, %124 : vector<8x32xf32>
    %cst_34 = arith.constant 1.000000e+00 : f32
    %127 = vector.broadcast %cst_34 : f32 to vector<8x32xf32>
    %128 = arith.subf %126, %127 : vector<8x32xf32>
    %129 = vector.extract_strided_slice %121 {offsets = [0, 96], sizes = [8, 32], strides = [1, 1]} : vector<8x128xf32> to vector<8x32xf32>
    %130 = arith.mulf %123, %111 : vector<8x32xf32>
    %131 = arith.mulf %122, %128 : vector<8x32xf32>
    %132 = arith.addf %130, %131 : vector<8x32xf32>
    %133 = math.tanh %132 : vector<8x32xf32>
    %134 = arith.mulf %129, %133 : vector<8x32xf32>
    %135 = vector.extract_strided_slice %5 {offsets = [48, 0], sizes = [8, 128], strides = [1, 1]} : vector<64x128xf32> to vector<8x128xf32>
    %cst_35 = arith.constant dense<0.000000e+00> : vector<8x128xf32>
    %136 = tpu.matmul %134, %6, %cst_35 {dimension_numbers = #tpu.dot_dimension_numbers<[1], [0], [0], [1], [0, 0, 1, 1], [], []>} : vector<8x32xf32>, vector<32x128xf32>, vector<8x128xf32> -> vector<8x128xf32>
    %137 = arith.addf %135, %136 : vector<8x128xf32>
    %138 = arith.negf %137 : vector<8x128xf32>
    %139 = math.exp %138 : vector<8x128xf32>
    %cst_36 = arith.constant 1.000000e+00 : f32
    %140 = vector.broadcast %cst_36 : f32 to vector<8x128xf32>
    %141 = arith.addf %140, %139 : vector<8x128xf32>
    %142 = arith.divf %140, %141 : vector<8x128xf32>
    %143 = vector.extract_strided_slice %142 {offsets = [0, 0], sizes = [8, 32], strides = [1, 1]} : vector<8x128xf32> to vector<8x32xf32>
    %144 = vector.extract_strided_slice %142 {offsets = [0, 32], sizes = [8, 32], strides = [1, 1]} : vector<8x128xf32> to vector<8x32xf32>
    %145 = vector.extract_strided_slice %142 {offsets = [0, 64], sizes = [8, 32], strides = [1, 1]} : vector<8x128xf32> to vector<8x32xf32>
    %cst_37 = arith.constant 2.000000e+00 : f32
    %146 = vector.broadcast %cst_37 : f32 to vector<8x32xf32>
    %147 = arith.mulf %146, %145 : vector<8x32xf32>
    %cst_38 = arith.constant 1.000000e+00 : f32
    %148 = vector.broadcast %cst_38 : f32 to vector<8x32xf32>
    %149 = arith.subf %147, %148 : vector<8x32xf32>
    %150 = vector.extract_strided_slice %142 {offsets = [0, 96], sizes = [8, 32], strides = [1, 1]} : vector<8x128xf32> to vector<8x32xf32>
    %151 = arith.mulf %144, %132 : vector<8x32xf32>
    %152 = arith.mulf %143, %149 : vector<8x32xf32>
    %153 = arith.addf %151, %152 : vector<8x32xf32>
    %154 = math.tanh %153 : vector<8x32xf32>
    %155 = arith.mulf %150, %154 : vector<8x32xf32>
    %156 = vector.extract_strided_slice %5 {offsets = [56, 0], sizes = [8, 128], strides = [1, 1]} : vector<64x128xf32> to vector<8x128xf32>
    %cst_39 = arith.constant dense<0.000000e+00> : vector<8x128xf32>
    %157 = tpu.matmul %155, %6, %cst_39 {dimension_numbers = #tpu.dot_dimension_numbers<[1], [0], [0], [1], [0, 0, 1, 1], [], []>} : vector<8x32xf32>, vector<32x128xf32>, vector<8x128xf32> -> vector<8x128xf32>
    %158 = arith.addf %156, %157 : vector<8x128xf32>
    %159 = arith.negf %158 : vector<8x128xf32>
    %160 = math.exp %159 : vector<8x128xf32>
    %cst_40 = arith.constant 1.000000e+00 : f32
    %161 = vector.broadcast %cst_40 : f32 to vector<8x128xf32>
    %162 = arith.addf %161, %160 : vector<8x128xf32>
    %163 = arith.divf %161, %162 : vector<8x128xf32>
    %164 = vector.extract_strided_slice %163 {offsets = [0, 0], sizes = [8, 32], strides = [1, 1]} : vector<8x128xf32> to vector<8x32xf32>
    %165 = vector.extract_strided_slice %163 {offsets = [0, 32], sizes = [8, 32], strides = [1, 1]} : vector<8x128xf32> to vector<8x32xf32>
    %166 = vector.extract_strided_slice %163 {offsets = [0, 64], sizes = [8, 32], strides = [1, 1]} : vector<8x128xf32> to vector<8x32xf32>
    %cst_41 = arith.constant 2.000000e+00 : f32
    %167 = vector.broadcast %cst_41 : f32 to vector<8x32xf32>
    %168 = arith.mulf %167, %166 : vector<8x32xf32>
    %cst_42 = arith.constant 1.000000e+00 : f32
    %169 = vector.broadcast %cst_42 : f32 to vector<8x32xf32>
    %170 = arith.subf %168, %169 : vector<8x32xf32>
    %171 = vector.extract_strided_slice %163 {offsets = [0, 96], sizes = [8, 32], strides = [1, 1]} : vector<8x128xf32> to vector<8x32xf32>
    %172 = arith.mulf %165, %153 : vector<8x32xf32>
    %173 = arith.mulf %164, %170 : vector<8x32xf32>
    %174 = arith.addf %172, %173 : vector<8x32xf32>
    %175 = math.tanh %174 : vector<8x32xf32>
    %176 = arith.mulf %171, %175 : vector<8x32xf32>
    %c0_43 = arith.constant 0 : index
    %c0_44 = arith.constant 0 : index
    %177 = vector.load %arg6[%c0_43, %c0_44] : memref<32x8xf32, #tpu.memory_space<vmem>>, vector<32x8xf32>
    %cst_45 = arith.constant dense<0.000000e+00> : vector<8x8xf32>
    %178 = tpu.matmul %176, %177, %cst_45 {dimension_numbers = #tpu.dot_dimension_numbers<[1], [0], [0], [1], [0, 0, 1, 1], [], []>} : vector<8x32xf32>, vector<32x8xf32>, vector<8x8xf32> -> vector<8x8xf32>
    %c0_46 = arith.constant 0 : index
    %c0_47 = arith.constant 0 : index
    %179 = vector.load %arg7[%c0_46, %c0_47] : memref<1x8xf32, #tpu.memory_space<vmem>>, vector<1x8xf32>
    %180 = vector.broadcast %179 : vector<1x8xf32> to vector<8x8xf32>
    %181 = arith.addf %178, %180 : vector<8x8xf32>
    %cst_48 = arith.constant dense<0xFF800000> : vector<8xf32>
    %182 = vector.multi_reduction <maximumf>, %181, %cst_48 [1] : vector<8x8xf32> to vector<8xf32>
    %183 = vector.shape_cast %182 : vector<8xf32> to vector<8x1xf32>
    %184 = vector.broadcast %183 : vector<8x1xf32> to vector<8x8xf32>
    %185 = arith.subf %181, %184 : vector<8x8xf32>
    %186 = math.exp %185 : vector<8x8xf32>
    %cst_49 = arith.constant dense<0.000000e+00> : vector<8xf32>
    %187 = vector.multi_reduction <add>, %186, %cst_49 [1] : vector<8x8xf32> to vector<8xf32>
    %188 = vector.shape_cast %187 : vector<8xf32> to vector<8x1xf32>
    %189 = tpu.reciprocal %188 : vector<8x1xf32> -> vector<8x1xf32>
    %190 = vector.broadcast %189 : vector<8x1xf32> to vector<8x8xf32>
    %191 = arith.mulf %186, %190 : vector<8x8xf32>
    %c0_50 = arith.constant 0 : index
    %c0_51 = arith.constant 0 : index
    %192 = vector.load %arg11[%c0_50, %c0_51] : memref<8x8xf32, #tpu.memory_space<vmem>>, vector<8x8xf32>
    tpu.vector_store %arg11[%c0_50, %c0_51], %191 {strides = array<i32>} : memref<8x8xf32, #tpu.memory_space<vmem>>, vector<8x8xf32>,
    %193 = vector.extract_strided_slice %191 {offsets = [0, 0], sizes = [8, 1], strides = [1, 1]} : vector<8x8xf32> to vector<8x1xf32>
    %194 = vector.broadcast %193 : vector<8x1xf32> to vector<8x32xf32>
    %195 = arith.mulf %194, %29 : vector<8x32xf32>
    %196 = vector.extract_strided_slice %191 {offsets = [0, 1], sizes = [8, 1], strides = [1, 1]} : vector<8x8xf32> to vector<8x1xf32>
    %197 = vector.broadcast %196 : vector<8x1xf32> to vector<8x32xf32>
    %198 = arith.mulf %197, %50 : vector<8x32xf32>
    %199 = arith.addf %195, %198 : vector<8x32xf32>
    %200 = vector.extract_strided_slice %191 {offsets = [0, 2], sizes = [8, 1], strides = [1, 1]} : vector<8x8xf32> to vector<8x1xf32>
    %201 = vector.broadcast %200 : vector<8x1xf32> to vector<8x32xf32>
    %202 = arith.mulf %201, %71 : vector<8x32xf32>
    %203 = arith.addf %199, %202 : vector<8x32xf32>
    %204 = vector.extract_strided_slice %191 {offsets = [0, 3], sizes = [8, 1], strides = [1, 1]} : vector<8x8xf32> to vector<8x1xf32>
    %205 = vector.broadcast %204 : vector<8x1xf32> to vector<8x32xf32>
    %206 = arith.mulf %205, %92 : vector<8x32xf32>
    %207 = arith.addf %203, %206 : vector<8x32xf32>
    %208 = vector.extract_strided_slice %191 {offsets = [0, 4], sizes = [8, 1], strides = [1, 1]} : vector<8x8xf32> to vector<8x1xf32>
    %209 = vector.broadcast %208 : vector<8x1xf32> to vector<8x32xf32>
    %210 = arith.mulf %209, %113 : vector<8x32xf32>
    %211 = arith.addf %207, %210 : vector<8x32xf32>
    %212 = vector.extract_strided_slice %191 {offsets = [0, 5], sizes = [8, 1], strides = [1, 1]} : vector<8x8xf32> to vector<8x1xf32>
    %213 = vector.broadcast %212 : vector<8x1xf32> to vector<8x32xf32>
    %214 = arith.mulf %213, %134 : vector<8x32xf32>
    %215 = arith.addf %211, %214 : vector<8x32xf32>
    %216 = vector.extract_strided_slice %191 {offsets = [0, 6], sizes = [8, 1], strides = [1, 1]} : vector<8x8xf32> to vector<8x1xf32>
    %217 = vector.broadcast %216 : vector<8x1xf32> to vector<8x32xf32>
    %218 = arith.mulf %217, %155 : vector<8x32xf32>
    %219 = arith.addf %215, %218 : vector<8x32xf32>
    %220 = vector.extract_strided_slice %191 {offsets = [0, 7], sizes = [8, 1], strides = [1, 1]} : vector<8x8xf32> to vector<8x1xf32>
    %221 = vector.broadcast %220 : vector<8x1xf32> to vector<8x32xf32>
    %222 = arith.mulf %221, %176 : vector<8x32xf32>
    %223 = arith.addf %219, %222 : vector<8x32xf32>
    %c0_52 = arith.constant 0 : index
    %c0_53 = arith.constant 0 : index
    %224 = vector.load %arg8[%c0_52, %c0_53] : memref<32x3xf32, #tpu.memory_space<vmem>>, vector<32x3xf32>
    %cst_54 = arith.constant dense<0.000000e+00> : vector<8x3xf32>
    %225 = tpu.matmul %223, %224, %cst_54 {dimension_numbers = #tpu.dot_dimension_numbers<[1], [0], [0], [1], [0, 0, 1, 1], [], []>} : vector<8x32xf32>, vector<32x3xf32>, vector<8x3xf32> -> vector<8x3xf32>
    %c0_55 = arith.constant 0 : index
    %c0_56 = arith.constant 0 : index
    %226 = vector.load %arg9[%c0_55, %c0_56] : memref<1x3xf32, #tpu.memory_space<vmem>>, vector<1x3xf32>
    %227 = vector.broadcast %226 : vector<1x3xf32> to vector<8x3xf32>
    %228 = arith.addf %225, %227 : vector<8x3xf32>
    %c0_57 = arith.constant 0 : index
    %c0_58 = arith.constant 0 : index
    %229 = vector.load %arg10[%c0_57, %c0_58] : memref<8x3xf32, #tpu.memory_space<vmem>>, vector<8x3xf32>
    tpu.vector_store %arg10[%c0_57, %c0_58], %228 {strides = array<i32>} : memref<8x3xf32, #tpu.memory_space<vmem>>, vector<8x3xf32>,
    return
  }
}

</mosaic_0001>

<bundles_post_ra>
// kernel: tpu_custom_call.1
= control target key start
LH: loop header
LB: loop body
LE: loop exit
PB: predicated region body
PF: predicated region fallthrough
CT: control target
= control target key end

     0   :  { %vm79_vm0 = vcmask 1043456   ;;  %v1638_v3 = vmov 0.0|0.0   ;;  %vm54_vm1 = vcmask 31744   ;;  %s1974_s0 = inlined_call_operand.vmem [shape: f32[64,4], index: 0, kind: input, shape index: {}]   ;;  %s1975_s1 = inlined_call_operand.vmem [shape: f32[8,32], index: 1, kind: input, shape index: {}]   ;;  %s1976_s2 = inlined_call_operand.vmem [shape: f32[8,32], index: 2, kind: input, shape index: {}]   ;;  %s1977_s3 = inlined_call_operand.vmem [shape: f32[4,128], index: 3, kind: input, shape index: {}]   ;;  %s1978_s4 = inlined_call_operand.vmem [shape: f32[32,128], index: 4, kind: input, shape index: {}]   ;;  %s1979_s5 = inlined_call_operand.vmem [shape: f32[1,128], index: 5, kind: input, shape index: {}]   ;;  %s1980_s6 = inlined_call_operand.vmem [shape: f32[32,8], index: 6, kind: input, shape index: {}]   ;;  %s1981_s7 = inlined_call_operand.vmem [shape: f32[1,8], index: 7, kind: input, shape index: {}]   ;;  %s1982_s8 = inlined_call_operand.vmem [shape: f32[32,3], index: 8, kind: input, shape index: {}]   ;;  %s1983_s9 = inlined_call_operand.vmem [shape: f32[1,3], index: 9, kind: input, shape index: {}]   ;;  %s1984_s10 = inlined_call_operand.vmem [shape: f32[8,3], index: 10, kind: output, shape index: {0}]   ;;  %s1985_s11 = inlined_call_operand.hbm [shape: f32[8,8], index: 11, kind: output, shape index: {1}]  }
   0x1   :  { %v188_v0 = vld [vmem:[%s1978_s4] sm:$0xff]  ;;  %v189_v1 = vld [vmem:[%s1978_s4 + $0x8] sm:$0xff]  ;;  %1479 = vmatprep.subr.bf16.mxu1 %v1638_v3  ;;  %v190_v7 = vld [vmem:[%s1978_s4 + $0x10] sm:$0xff] }
   0x2   :  { %v46_v2 = vld [vmem:[%s1977_s3] sm:$0xf]  ;;  %v1722_v4 = vpack.c.bf16 %v189_v1, %v188_v0  ;;  %v39_v6 = vld [vmem:[%s1974_s0 + $0x8] sm:$0xff]  ;;  %v191_v8 = vld [vmem:[%s1978_s4 + $0x18] sm:$0xff] }
   0x3   :  { %1355 = vmatprep.subr.msk.mxu0 %vm79_vm0, %v46_v2  ;;  %v38_v5 = vld [vmem:[%s1974_s0] sm:$0xff] }
   0x4   :  { %1356 = vmatpush3.msk.msra.mxu0 %vm79_vm0, %v46_v2  ;;  %1357 = vmatprep.mubr.msk.f32.mxu0 %vm54_vm1, %v38_v5 }
   0x5   :  { %17 = vsyncpa [#allocation3], 0  ;;  %1481 = vmatpush3.bf16.msra.mxu1 %v1722_v4  ;;  %1358 = vmatmul.mubr.msk.f32.vlgmr.msra.gmra.mrb[0].mxu0 %vm54_vm1, %v39_v6  ;;  %v1739_v9 = vpack.c.bf16 %v191_v8, %v190_v7  ;;  %vm1639_vm2 = vmmov 0   ;;  %v1640_v10 = vmov 0.0   ;;  %v192_v11 = vld [vmem:[%s1975_s1] sm:$0xff]  ;;  %vm194_vm3 = vcmask 261120  }
   0x6   :  { %1482 = vmatprep.subr.bf16.mxu1 %v1638_v3  ;;  %1377 = vmatprep.mubr.msk.f32.mxu1 %vm1639_vm2, %v1640_v10  ;;  %v1764_v13 = vld [vmem:[%s1979_s5] ss:$0 sm:$0xff]  ;;  %s1641_s13 = smov 64   ;;  %s1642_s15 = smov 32   ;;  %v40_v51 = vld [vmem:[%s1974_s0 + $0x10] sm:$0xff]  ;;  %v41_v52 = vld [vmem:[%s1974_s0 + $0x18] sm:$0xff] }
   0x7   :  { %1491 = vmatprep.subr.bf16.mxu0 %v1638_v3  ;;  %v193_v25 = vld [vmem:[%s1976_s2] sm:$0xff]  ;;  %1360 = vmatprep.mubr.msk.f32.mxu0 %vm54_vm1, %v40_v51  ;;  %v43_v54 = vld [vmem:[%s1974_s0 + $0x28] sm:$0xff]  ;;  %v44_v55 = vld [vmem:[%s1974_s0 + $0x30] sm:$0xff]  ;;  %vm1091_vm4 = vcmask 64512  }
   0x8   :  { %1493 = vmatpush3.bf16.msra.mxu0 %v1722_v4  ;;  %v42_v53 = vld [vmem:[%s1974_s0 + $0x20] sm:$0xff]  ;;  %v45_v56 = vld [vmem:[%s1974_s0 + $0x38] sm:$0xff] }
   0x9   :  { %1484 = vmatpush3.bf16.msra.mxu1 %v1739_v9  ;;  %1494 = vmatprep.subr.bf16.mxu0 %v1638_v3 }
   0xa   :  { %1485 = vmatprep.subr.bf16.mxu1 %v1638_v3  ;;  %1361 = vmatmul.mubr.msk.f32.gmra.mrb[2].mxu0 %vm54_vm1, %v41_v52 }
   0xb   :  { %1363 = vmatprep.mubr.msk.f32.mxu0 %vm54_vm1, %v42_v53 }
   0xc   :  { %1378 = vmatmul.mubr.msk.f32.vlgmr.msra.gmra.mrb[0].mxu1 %vm194_vm3, %v192_v11  ;;  %1496 = vmatpush3.bf16.msra.mxu0 %v1739_v9 }
   0xd   :  { %1487 = vmatpush3.bf16.msra.mxu1 %v1722_v4  ;;  %1388 = vmatprep.mubr.msk.f32.mxu1 %vm1639_vm2, %v1640_v10 }
   0xe   :  { %1488 = vmatprep.subr.bf16.mxu1 %v1638_v3  ;;  %1503 = vmatprep.subr.bf16.mxu0 %v1638_v3 }
   0xf   :  { %1364 = vmatmul.mubr.msk.f32.gmra.mrb[4].mxu0 %vm54_vm1, %v43_v54 }
  0x10   :  { %1366 = vmatprep.mubr.msk.f32.mxu0 %vm54_vm1, %v44_v55 }
  0x11   :  { %1490 = vmatpush3.bf16.msra.mxu1 %v1739_v9 }
  0x12   :  { %1497 = vmatprep.subr.bf16.mxu1 %v1638_v3 }
  0x13   :  { %1367 = vmatmul.mubr.msk.f32.gmra.mrb[6].mxu0 %vm54_vm1, %v45_v56 }
  0x14   :  { %1399 = vmatprep.mubr.msk.f32.mxu0 %vm1639_vm2, %v1640_v10 }
  0xd8   :  { %v1359_v12 = vpop.f32.mrb[0].mxu0 }
  0xd9   :  { %v149_v14 = vpop.f32.mrb[1].mxu0  ;;  %v155_v36 = vadd.f32 %v1359_v12, %v1764_v13 }
  0xda   :  { %v150_v15 = vadd.f32 %v1764_v13, %v149_v14 }
  0xdd   :  { %v1362_v60 = vpop.f32.mrb[2].mxu0 }
  0xde   :  { %v159_v61 = vpop.f32.mrb[3].mxu0 }
  0xdf   :  { %v264_v16 = vpop.f32.mrb[0].mxu1  ;;  %v160_v5 = vadd.f32 %v1764_v13, %v159_v61 }
  0xe0   :  { %v268_v17 = vadd.f32 %v264_v16, %v150_v15  ;;  %v1379_v18 = vpop.f32.mrb[1].mxu1 }
  0xe2   :  { %v1269_v19 = vmul.f32 -1.442695, %v268_v17  ;;  %v1819_v62 = vpop.f32.mrb[4].mxu0 }
  0xe3   :  { %v1821_v63 = vpop.f32.mrb[5].mxu0 }
  0xe4   :  { %1562 = vpow2.f32 %v1269_v19 }
  0xe6   :  { %v1823_v0 = vpop.f32.mrb[6].mxu0 }
  0xe7   :  { %v1825_v1 = vpop.f32.mrb[7].mxu0 }
  0xee   :  { %v1563_v20 = vpop.eup %1562 }
  0xef   :  { %v272_v21 = vadd.f32 1.0, %v1563_v20 }
  0xf1   :  { %1564 = vrcp.f32 %v272_v21 }
  0xfb   :  { %v1565_v22 = vpop.eup %1564 }
  0xfc   :  { %v275_v23 = vmul.f32 2.0, %v1565_v22 }
  0xfe   :  { %v1270_v24 = vadd.f32 -1.0, %v275_v23 }
 0x100   :  { %283 = vrot.lane.b32.xlu0 %v1270_v24, %s1641_s13 }
 0x104   :  { %278 = vrot.lane.b32.xlu0 %v193_v25, %s1642_s15 }
 0x172   :  { %v284_v26 = vpop.permute.xlu0 %283 }
 0x173   :  { %v286_v27 = vmul.f32 %v1565_v22, %v284_v26 }
 0x175   :  { %288 = vrot.lane.b32.xlu1 %v286_v27, %s1642_s15  ;;  %v165_v27 = vadd.f32 %v1362_v60, %v1764_v13 }
 0x176   :  { %v279_v28 = vpop.permute.xlu0 %278 }
 0x177   :  { %v281_v29 = vmul.f32 %v1565_v22, %v279_v28 }
 0x1e7   :  { %v289_v30 = vpop.permute.xlu1 %288 }
 0x1e8   :  { %v291_v31 = vadd.f32 %v289_v30, %v281_v29 }
 0x1ea   :  { %1566 = vtanh.f32 %v291_v31 }
 0x1f4   :  { %v1567_v32 = vpop.eup %1566 }
 0x1f5   :  { %294 = vrot.lane.b32.xlu1 %v1567_v32, %s1641_s13 }
 0x267   :  { %v295_v33 = vpop.permute.xlu1 %294 }
 0x268   :  { %v1774_v34 = vmul.f32 %v1565_v22, %v295_v33 }
 0x26a   :  { %299 = vrot.lane.b32.xlu0 %v1774_v34, %s1642_s15 }
 0x2dc   :  { %v300_v35 = vpop.permute.xlu0 %299 }
 0x2dd   :  { %1389 = vmatmul.mubr.msk.f32.vlgmr.msra.gmra.mrb[2].mxu1 %vm194_vm3, %v300_v35 }
 0x2de   :  { %1499 = vmatpush3.bf16.msra.mxu1 %v1722_v4  ;;  %1410 = vmatprep.mubr.msk.f32.mxu1 %vm1639_vm2, %v1640_v10 }
 0x2df   :  { %1500 = vmatprep.subr.bf16.mxu1 %v1638_v3 }
 0x2e2   :  { %1502 = vmatpush3.bf16.msra.mxu1 %v1739_v9 }
 0x2e3   :  { %1509 = vmatprep.subr.bf16.mxu1 %v1638_v3 }
 0x3b0   :  { %v369_v37 = vpop.f32.mrb[2].mxu1 }
 0x3b1   :  { %v373_v38 = vadd.f32 %v369_v37, %v155_v36  ;;  %v1390_v39 = vpop.f32.mrb[3].mxu1 }
 0x3b3   :  { %v1272_v40 = vmul.f32 -1.442695, %v373_v38 }
 0x3b5   :  { %1568 = vpow2.f32 %v1272_v40 }
 0x3bf   :  { %v1569_v41 = vpop.eup %1568 }
 0x3c0   :  { %v377_v42 = vadd.f32 1.0, %v1569_v41 }
 0x3c2   :  { %1570 = vrcp.f32 %v377_v42 }
 0x3cc   :  { %v1571_v43 = vpop.eup %1570 }
 0x3cd   :  { %v380_v44 = vmul.f32 2.0, %v1571_v43  ;;  %v382_v48 = vmul.f32 %v1571_v43, %v291_v31 }
 0x3cf   :  { %v1273_v45 = vadd.f32 -1.0, %v380_v44 }
 0x3d1   :  { %384 = vrot.lane.b32.xlu1 %v1273_v45, %s1641_s13 }
 0x443   :  { %v385_v46 = vpop.permute.xlu1 %384 }
 0x444   :  { %v387_v47 = vmul.f32 %v1571_v43, %v385_v46 }
 0x446   :  { %389 = vrot.lane.b32.xlu0 %v387_v47, %s1642_s15  ;;  %v170_v47 = vadd.f32 %v1764_v13, %v1821_v63 }
 0x4b8   :  { %v390_v49 = vpop.permute.xlu0 %389 }
 0x4b9   :  { %v392_v50 = vadd.f32 %v390_v49, %v382_v48 }
 0x4bb   :  { %1572 = vtanh.f32 %v392_v50 }
 0x4c5   :  { %v1573_v57 = vpop.eup %1572 }
 0x4c6   :  { %395 = vrot.lane.b32.xlu1 %v1573_v57, %s1641_s13 }
 0x538   :  { %v396_v58 = vpop.permute.xlu1 %395 }
 0x539   :  { %v1815_v59 = vmul.f32 %v1571_v43, %v396_v58 }
 0x53b   :  { %400 = vrot.lane.b32.xlu0 %v1815_v59, %s1642_s15 }
 0x5ad   :  { %v401_v2 = vpop.permute.xlu0 %400 }
 0x5ae   :  { %1400 = vmatmul.mubr.msk.f32.vlgmr.msra.gmra.mrb[8].mxu0 %vm194_vm3, %v401_v2 }
 0x5af   :  { %1505 = vmatpush3.bf16.msra.mxu0 %v1722_v4  ;;  %1421 = vmatprep.mubr.msk.f32.mxu0 %vm1639_vm2, %v1640_v10 }
 0x5b0   :  { %1506 = vmatprep.subr.bf16.mxu0 %v1638_v3 }
 0x5b3   :  { %1508 = vmatpush3.bf16.msra.mxu0 %v1739_v9 }
 0x5b4   :  { %1515 = vmatprep.subr.bf16.mxu0 %v1638_v3 }
 0x681   :  { %v470_v6 = vpop.f32.mrb[8].mxu0 }
 0x682   :  { %v474_v7 = vadd.f32 %v470_v6, %v160_v5  ;;  %v1401_v8 = vpop.f32.mrb[9].mxu0 }
 0x683   :  { %v175_v8 = vadd.f32 %v1819_v62, %v1764_v13 }
 0x684   :  { %v1275_v11 = vmul.f32 -1.442695, %v474_v7 }
 0x686   :  { %1574 = vpow2.f32 %v1275_v11 }
 0x690   :  { %v1575_v12 = vpop.eup %1574 }
 0x691   :  { %v478_v14 = vadd.f32 1.0, %v1575_v12 }
 0x693   :  { %1576 = vrcp.f32 %v478_v14 }
 0x69d   :  { %v1577_v15 = vpop.eup %1576 }
 0x69e   :  { %v481_v16 = vmul.f32 2.0, %v1577_v15  ;;  %v483_v20 = vmul.f32 %v1577_v15, %v392_v50 }
 0x6a0   :  { %v1276_v17 = vadd.f32 -1.0, %v481_v16 }
 0x6a2   :  { %485 = vrot.lane.b32.xlu1 %v1276_v17, %s1641_s13 }
 0x714   :  { %v486_v18 = vpop.permute.xlu1 %485 }
 0x715   :  { %v488_v19 = vmul.f32 %v1577_v15, %v486_v18 }
 0x717   :  { %490 = vrot.lane.b32.xlu0 %v488_v19, %s1642_s15 }
 0x789   :  { %v491_v21 = vpop.permute.xlu0 %490 }
 0x78a   :  { %v493_v22 = vadd.f32 %v491_v21, %v483_v20 }
 0x78c   :  { %1578 = vtanh.f32 %v493_v22 }
 0x796   :  { %v1579_v23 = vpop.eup %1578 }
 0x797   :  { %496 = vrot.lane.b32.xlu1 %v1579_v23, %s1641_s13 }
 0x809   :  { %v497_v24 = vpop.permute.xlu1 %496 }
 0x80a   :  { %v1838_v25 = vmul.f32 %v1577_v15, %v497_v24 }
 0x80c   :  { %501 = vrot.lane.b32.xlu0 %v1838_v25, %s1642_s15 }
 0x87e   :  { %v502_v26 = vpop.permute.xlu0 %501 }
 0x87f   :  { %1411 = vmatmul.mubr.msk.f32.vlgmr.msra.gmra.mrb[4].mxu1 %vm194_vm3, %v502_v26 }
 0x880   :  { %1511 = vmatpush3.bf16.msra.mxu1 %v1722_v4  ;;  %1432 = vmatprep.mubr.msk.f32.mxu1 %vm1639_vm2, %v1640_v10 }
 0x881   :  { %1512 = vmatprep.subr.bf16.mxu1 %v1638_v3 }
 0x884   :  { %1514 = vmatpush3.bf16.msra.mxu1 %v1739_v9 }
 0x885   :  { %1521 = vmatprep.subr.bf16.mxu1 %v1638_v3 }
 0x952   :  { %v571_v28 = vpop.f32.mrb[4].mxu1 }
 0x953   :  { %v575_v29 = vadd.f32 %v571_v28, %v165_v27  ;;  %v1412_v30 = vpop.f32.mrb[5].mxu1  ;;  %v180_v28 = vadd.f32 %v1764_v13, %v1825_v1 }
 0x955   :  { %v1278_v31 = vmul.f32 -1.442695, %v575_v29 }
 0x957   :  { %1580 = vpow2.f32 %v1278_v31 }
 0x961   :  { %v1581_v32 = vpop.eup %1580 }
 0x962   :  { %v579_v33 = vadd.f32 1.0, %v1581_v32 }
 0x964   :  { %1582 = vrcp.f32 %v579_v33 }
 0x96e   :  { %v1583_v35 = vpop.eup %1582 }
 0x96f   :  { %v582_v36 = vmul.f32 2.0, %v1583_v35  ;;  %v584_v40 = vmul.f32 %v1583_v35, %v493_v22 }
 0x971   :  { %v1279_v37 = vadd.f32 -1.0, %v582_v36 }
 0x973   :  { %586 = vrot.lane.b32.xlu1 %v1279_v37, %s1641_s13 }
 0x9e5   :  { %v587_v38 = vpop.permute.xlu1 %586 }
 0x9e6   :  { %v589_v39 = vmul.f32 %v1583_v35, %v587_v38 }
 0x9e8   :  { %591 = vrot.lane.b32.xlu0 %v589_v39, %s1642_s15 }
 0xa5a   :  { %v592_v41 = vpop.permute.xlu0 %591 }
 0xa5b   :  { %v594_v42 = vadd.f32 %v592_v41, %v584_v40 }
 0xa5d   :  { %1584 = vtanh.f32 %v594_v42 }
 0xa67   :  { %v1585_v43 = vpop.eup %1584 }
 0xa68   :  { %597 = vrot.lane.b32.xlu1 %v1585_v43, %s1641_s13 }
 0xada   :  { %v598_v44 = vpop.permute.xlu1 %597 }
 0xadb   :  { %v1853_v45 = vmul.f32 %v1583_v35, %v598_v44 }
 0xadd   :  { %602 = vrot.lane.b32.xlu0 %v1853_v45, %s1642_s15 }
 0xb4f   :  { %v603_v46 = vpop.permute.xlu0 %602 }
 0xb50   :  { %1422 = vmatmul.mubr.msk.f32.vlgmr.msra.gmra.mrb[10].mxu0 %vm194_vm3, %v603_v46 }
 0xb51   :  { %1517 = vmatpush3.bf16.msra.mxu0 %v1722_v4  ;;  %1443 = vmatprep.mubr.msk.f32.mxu0 %vm1639_vm2, %v1640_v10 }
 0xb52   :  { %1518 = vmatprep.subr.bf16.mxu0 %v1638_v3 }
 0xb55   :  { %1520 = vmatpush3.bf16.msra.mxu0 %v1739_v9 }
 0xb56   :  { %1527 = vmatprep.subr.bf16.mxu0 %v1638_v3 }
 0xc23   :  { %v672_v48 = vpop.f32.mrb[10].mxu0 }
 0xc24   :  { %v676_v49 = vadd.f32 %v672_v48, %v170_v47  ;;  %v1423_v50 = vpop.f32.mrb[11].mxu0  ;;  %v185_v48 = vadd.f32 %v1823_v0, %v1764_v13  ;;  %v1005_v0 = vld [vmem:[%s1980_s6] sm:$0xff] }
 0xc26   :  { %v1281_v51 = vmul.f32 -1.442695, %v676_v49 }
 0xc28   :  { %1586 = vpow2.f32 %v1281_v51 }
 0xc32   :  { %v1587_v52 = vpop.eup %1586 }
 0xc33   :  { %v680_v53 = vadd.f32 1.0, %v1587_v52 }
 0xc35   :  { %1588 = vrcp.f32 %v680_v53 }
 0xc3f   :  { %v1589_v54 = vpop.eup %1588 }
 0xc40   :  { %v683_v55 = vmul.f32 2.0, %v1589_v54  ;;  %v685_v60 = vmul.f32 %v1589_v54, %v594_v42 }
 0xc42   :  { %v1282_v56 = vadd.f32 -1.0, %v683_v55 }
 0xc44   :  { %687 = vrot.lane.b32.xlu1 %v1282_v56, %s1641_s13 }
 0xcb6   :  { %v688_v57 = vpop.permute.xlu1 %687 }
 0xcb7   :  { %v690_v58 = vmul.f32 %v1589_v54, %v688_v57 }
 0xcb9   :  { %692 = vrot.lane.b32.xlu0 %v690_v58, %s1642_s15 }
 0xd2b   :  { %v693_v61 = vpop.permute.xlu0 %692 }
 0xd2c   :  { %v695_v63 = vadd.f32 %v693_v61, %v685_v60 }
 0xd2e   :  { %1590 = vtanh.f32 %v695_v63 }
 0xd38   :  { %v1591_v2 = vpop.eup %1590 }
 0xd39   :  { %698 = vrot.lane.b32.xlu1 %v1591_v2, %s1641_s13  ;;  %v1007_v2 = vld [vmem:[%s1980_s6 + $0x10] sm:$0xff] }
 0xdab   :  { %v699_v5 = vpop.permute.xlu1 %698 }
 0xdac   :  { %v1869_v6 = vmul.f32 %v1589_v54, %v699_v5 }
 0xdae   :  { %703 = vrot.lane.b32.xlu0 %v1869_v6, %s1642_s15 }
 0xe20   :  { %v704_v7 = vpop.permute.xlu0 %703 }
 0xe21   :  { %1433 = vmatmul.mubr.msk.f32.vlgmr.msra.gmra.mrb[6].mxu1 %vm194_vm3, %v704_v7  ;;  %v1008_v7 = vld [vmem:[%s1980_s6 + $0x18] sm:$0xff] }
 0xe22   :  { %1523 = vmatpush3.bf16.msra.mxu1 %v1722_v4  ;;  %1454 = vmatprep.mubr.msk.f32.mxu1 %vm1639_vm2, %v1640_v10 }
 0xe23   :  { %1524 = vmatprep.subr.bf16.mxu1 %v1638_v3 }
 0xe26   :  { %1526 = vmatpush3.bf16.msra.mxu1 %v1739_v9 }
 0xe27   :  { %1533 = vmatprep.subr.bf16.mxu1 %v1638_v3 }
 0xef4   :  { %v773_v11 = vpop.f32.mrb[6].mxu1 }
 0xef5   :  { %v777_v12 = vadd.f32 %v773_v11, %v175_v8  ;;  %v1434_v14 = vpop.f32.mrb[7].mxu1  ;;  %v1531_v8 = vpack.c.bf16 %v1008_v7, %v1007_v2 }
 0xef7   :  { %v1284_v15 = vmul.f32 -1.442695, %v777_v12 }
 0xef9   :  { %1592 = vpow2.f32 %v1284_v15 }
 0xf03   :  { %v1593_v16 = vpop.eup %1592 }
 0xf04   :  { %v781_v17 = vadd.f32 1.0, %v1593_v16  ;;  %v1292_v16 = vld [vmem:[%s1981_s7] ss:$0 sm:$0xff] }
 0xf06   :  { %1594 = vrcp.f32 %v781_v17 }
 0xf10   :  { %v1595_v4 = vpop.eup %1594 }
 0xf11   :  { %v784_v18 = vmul.f32 2.0, %v1595_v4  ;;  %v786_v21 = vmul.f32 %v1595_v4, %v695_v63  ;;  %v1006_v63 = vld [vmem:[%s1980_s6 + $0x8] sm:$0xff] }
 0xf12   :  { %v1528_v5 = vpack.c.bf16 %v1006_v63, %v1005_v0 }
 0xf13   :  { %v1285_v19 = vadd.f32 -1.0, %v784_v18 }
 0xf15   :  { %788 = vrot.lane.b32.xlu1 %v1285_v19, %s1641_s13 }
 0xf87   :  { %v789_v20 = vpop.permute.xlu1 %788 }
 0xf88   :  { %v791_v9 = vmul.f32 %v1595_v4, %v789_v20 }
 0xf8a   :  { %793 = vrot.lane.b32.xlu0 %v791_v9, %s1642_s15 }
 0xffc   :  { %v794_v22 = vpop.permute.xlu0 %793 }
 0xffd   :  { %v796_v62 = vadd.f32 %v794_v22, %v786_v21 }
 0xfff   :  { %1596 = vtanh.f32 %v796_v62 }
0x1009   :  { %v1597_v23 = vpop.eup %1596 }
0x100a   :  { %799 = vrot.lane.b32.xlu1 %v1597_v23, %s1641_s13  ;;  %v1643_v23 = vmov 1  }
0x100b   :  { %1554 = vset.pattern.permute.xlu1 %v1643_v23 }
0x107c   :  { %v800_v24 = vpop.permute.xlu1 %799 }
0x107d   :  { %v1885_v26 = vmul.f32 %v1595_v4, %v800_v24  ;;  %v1644_v24 = vmov 0  }
0x107e   :  { %1553 = vset.pattern.permute.xlu0 %v1644_v24 }
0x107f   :  { %804 = vrot.lane.b32.xlu0 %v1885_v26, %s1642_s15 }
0x10f1   :  { %v805_v27 = vpop.permute.xlu0 %804 }
0x10f2   :  { %1444 = vmatmul.mubr.msk.f32.vlgmr.msra.gmra.mrb[12].mxu0 %vm194_vm3, %v805_v27 }
0x10f3   :  { %1465 = vmatprep.mubr.msk.f32.mxu0 %vm1639_vm2, %v1640_v10  ;;  %1529 = vmatpush3.bf16.msra.mxu0 %v1528_v5 }
0x10f4   :  { %1530 = vmatprep.subr.bf16.mxu0 %v1638_v3 }
0x10f7   :  { %1532 = vmatpush3.bf16.msra.mxu0 %v1531_v8 }
0x11c5   :  { %v874_v29 = vpop.f32.mrb[12].mxu0 }
0x11c6   :  { %v878_v30 = vadd.f32 %v874_v29, %v180_v28  ;;  %v1445_v31 = vpop.f32.mrb[13].mxu0 }
0x11c7   :  { %v1646_v31 = vmov 7  }
0x11c8   :  { %v1287_v32 = vmul.f32 -1.442695, %v878_v30  ;;  %v1645_v30 = vmov 2  }
0x11ca   :  { %1598 = vpow2.f32 %v1287_v32  ;;  %v1647_v32 = vmov 3  }
0x11d4   :  { %v1599_v33 = vpop.eup %1598 }
0x11d5   :  { %v882_v35 = vadd.f32 1.0, %v1599_v33  ;;  %v1648_v33 = vmov 4  }
0x11d7   :  { %1600 = vrcp.f32 %v882_v35  ;;  %v1649_v35 = vmov 5  }
0x11e1   :  { %v1601_v36 = vpop.eup %1600 }
0x11e2   :  { %v885_v37 = vmul.f32 2.0, %v1601_v36  ;;  %v887_v41 = vmul.f32 %v1601_v36, %v796_v62 }
0x11e4   :  { %v1288_v38 = vadd.f32 -1.0, %v885_v37  ;;  %v1152_v37 = vld [vmem:[%s1982_s8] sm:$0xff] }
0x11e6   :  { %889 = vrot.lane.b32.xlu1 %v1288_v38, %s1641_s13  ;;  %v1153_v38 = vld [vmem:[%s1982_s8 + $0x8] sm:$0xff] }
0x1258   :  { %v890_v39 = vpop.permute.xlu1 %889 }
0x1259   :  { %v892_v40 = vmul.f32 %v1601_v36, %v890_v39  ;;  %v1154_v39 = vld [vmem:[%s1982_s8 + $0x10] sm:$0xff] }
0x125b   :  { %894 = vrot.lane.b32.xlu0 %v892_v40, %s1642_s15  ;;  %v1534_v40 = vpack.c.bf16 %v1153_v38, %v1152_v37 }
0x12cd   :  { %v895_v42 = vpop.permute.xlu0 %894 }
0x12ce   :  { %v897_v1 = vadd.f32 %v895_v42, %v887_v41  ;;  %v1155_v41 = vld [vmem:[%s1982_s8 + $0x18] sm:$0xff]  ;;  %s1651_s8 = smov [#allocation2]  }
0x12cf   :  { %v1537_v42 = vpack.c.bf16 %v1155_v41, %v1154_v39  ;;  %s1248_s19 = sshll.u32 %s1651_s8, 4  ;;  %s1249_s19 = int_to_ptr.vmem [resolvable:$true] %s1248_s19 }
0x12d0   :  { %1602 = vtanh.f32 %v897_v1  ;;  %s1614_s20 = scalar_lea.vmem %s1249_s19, 128  ;;  %p1619_p1 = scmp.lt.s32.totalorder %s1249_s19, %s1249_s19 }
0x12d1   :  { %p1615_p0 = scmp.ne.s32.totalorder %s1249_s19, %s1614_s20  ;;  %p1620_p2 = scmp.lt.s32.totalorder %s1614_s20, %s1614_s20 }
0x12d3   :  { %p1621_p3 = por %p1620_p2, %p1619_p1 }
0x12d5   :  { %p1622_p4 = pnand %p1621_p3, %p1615_p0 }
0x12da   :  { %v1603_v43 = vpop.eup %1602 }
0x12db   :  { %900 = vrot.lane.b32.xlu1 %v1603_v43, %s1641_s13 }
0x134d   :  { %v901_v44 = vpop.permute.xlu1 %900 }
0x134e   :  { %v1897_v46 = vmul.f32 %v1601_v36, %v901_v44  ;;  %v1650_v36 = vmov 6  }
0x1350   :  { %905 = vrot.lane.b32.xlu0 %v1897_v46, %s1642_s15 }
0x13c2   :  { %v906_v47 = vpop.permute.xlu0 %905 }
0x13c3   :  { %1455 = vmatmul.mubr.msk.f32.vlgmr.msra.gmra.mrb[8].mxu1 %vm194_vm3, %v906_v47 }
0x13c4   :  { %1476 = vmatprep.mubr.msk.f32.mxu1 %vm1639_vm2, %v1640_v10  ;;  %1535 = vmatpush3.bf16.msra.mxu1 %v1534_v40 }
0x13c5   :  { %1536 = vmatprep.subr.bf16.mxu1 %v1638_v3 }
0x13c8   :  { %1538 = vmatpush3.bf16.msra.mxu1 %v1537_v42 }
0x1496   :  { %v975_v49 = vpop.f32.mrb[8].mxu1 }
0x1497   :  { %v979_v50 = vadd.f32 %v975_v49, %v185_v48  ;;  %v1456_v51 = vpop.f32.mrb[9].mxu1 }
0x1499   :  { %v1290_v52 = vmul.f32 -1.442695, %v979_v50 }
0x149b   :  { %1604 = vpow2.f32 %v1290_v52 }
0x14a5   :  { %v1605_v53 = vpop.eup %1604 }
0x14a6   :  { %v983_v54 = vadd.f32 1.0, %v1605_v53 }
0x14a8   :  { %1606 = vrcp.f32 %v983_v54 }
0x14b2   :  { %v1607_v55 = vpop.eup %1606 }
0x14b3   :  { %v986_v56 = vmul.f32 2.0, %v1607_v55  ;;  %v988_v10 = vmul.f32 %v1607_v55, %v897_v1 }
0x14b5   :  { %v1291_v57 = vadd.f32 -1.0, %v986_v56 }
0x14b7   :  { %990 = vrot.lane.b32.xlu1 %v1291_v57, %s1641_s13 }
0x1529   :  { %v991_v58 = vpop.permute.xlu1 %990 }
0x152a   :  { %v993_v60 = vmul.f32 %v1607_v55, %v991_v58 }
0x152c   :  { %995 = vrot.lane.b32.xlu0 %v993_v60, %s1642_s15 }
0x159e   :  { %v996_v61 = vpop.permute.xlu0 %995 }
0x159f   :  { %v998_v13 = vadd.f32 %v996_v61, %v988_v10 }
0x15a1   :  { %1608 = vtanh.f32 %v998_v13 }
0x15ab   :  { %v1609_v11 = vpop.eup %1608 }
0x15ac   :  { %1001 = vrot.lane.b32.xlu1 %v1609_v11, %s1641_s13 }
0x161e   :  { %v1002_v12 = vpop.permute.xlu1 %1001 }
0x161f   :  { %v1922_v14 = vmul.f32 %v1607_v55, %v1002_v12 }
0x1621   :  { %1017 = vrot.lane.b32.xlu0 %v1922_v14, %s1642_s15 }
0x1693   :  { %v1018_v15 = vpop.permute.xlu0 %1017 }
0x1694   :  { %1466 = vmatmul.mubr.msk.f32.vlgmr.msra.gmra.mrb[14].mxu0 %vm194_vm3, %v1018_v15 }
0x1767   :  { %v1087_v17 = vpop.f32.mrb[14].mxu0 }
0x1768   :  { %v1088_v4 = vadd.f32 %v1292_v16, %v1087_v17  ;;  %v1467_v18 = vpop.f32.mrb[15].mxu0 }
0x176a   :  { %v1092_v19 = vsel %vm1091_vm4, %v1088_v4, -inf }
0x176b   :  { %1093 = vmax.xlane.f32.xlu1 %v1092_v19 }
0x17f8   :  { %v1094_v20 = vpop.xlane.xlu1 %1093 }
0x17f9   :  { %v1095_v9 = vsub.f32 %v1088_v4, %v1094_v20 }
0x17fb   :  { %v1096_v21 = vmul.f32 1.442695, %v1095_v9 }
0x17fd   :  { %1610 = vpow2.f32 %v1096_v21 }
0x1807   :  { %v1611_v22 = vpop.eup %1610 }
0x1808   :  { %v1098_v62 = vsel %vm1091_vm4, %v1611_v22, 0.0 }
0x1809   :  { %1099 = vadd.xlane.f32.xlu0 %v1098_v62 }
0x1896   :  { %v1100_v27 = vpop.xlane.xlu0 %1099 }
0x1897   :  { %1612 = vrcp.f32 %v1100_v27 }
0x18a1   :  { %v1613_v28 = vpop.eup %1612 }
0x18a2   :  { %v1102_v29 = vmul.f32 %v1613_v28, %v1611_v22 }
0x18a4   :  { %1103 = vst.msk [vmem:[#allocation2] sm:$0xff] %vm1091_vm4, %v1102_v29  ;;  %1111 = vperm.xlu1 %1554, %v1102_v29   ;;  %1106 = vperm.xlu0 %1553, %v1102_v29  }
0x18a8   :  { %1555 = vset.pattern.permute.xlu1 %v1645_v30  ;;  %1561 = vset.pattern.permute.xlu0 %v1646_v31 }
0x18a9   :  { %1117 = vperm.xlu1 %1555, %v1102_v29  }
0x18ad   :  { %1556 = vset.pattern.permute.xlu1 %v1647_v32 }
0x18ae   :  { %1123 = vperm.xlu1 %1556, %v1102_v29  }
0x18b2   :  { %1557 = vset.pattern.permute.xlu1 %v1648_v33 }
0x18b3   :  { %1129 = vperm.xlu1 %1557, %v1102_v29  }
0x18b7   :  { %1558 = vset.pattern.permute.xlu1 %v1649_v35 }
0x18b8   :  { %1135 = vperm.xlu1 %1558, %v1102_v29  }
0x18bc   :  { %1559 = vset.pattern.permute.xlu1 %v1650_v36 }
0x18bd   :  { %1141 = vperm.xlu1 %1559, %v1102_v29  }
0x18c1   :  { %1560 = vset.pattern.permute.xlu1 %v1646_v31 }
0x18c2   :  { %1147 = vperm.xlu1 %1560, %v1102_v29  }
0x1923   :  { %v1112_v1 = vpop.permute.xlu1 %1111  ;;  %v1107_v47 = vpop.permute.xlu0 %1106 }
0x1924   :  { %v1114_v49 = vmul.f32 %v1112_v1, %v1815_v59  ;;  %v1109_v50 = vmul.f32 %v1107_v47, %v1774_v34 }
0x1926   :  { %v1115_v53 = vadd.f32 %v1114_v49, %v1109_v50 }
0x1928   :  { %v1118_v43 = vpop.permute.xlu1 %1117 }
0x1929   :  { %v1120_v51 = vmul.f32 %v1118_v43, %v1838_v25 }
0x192b   :  { %v1121_v55 = vadd.f32 %v1120_v51, %v1115_v53 }
0x192d   :  { %v1124_v44 = vpop.permute.xlu1 %1123 }
0x192e   :  { %v1126_v54 = vmul.f32 %v1124_v44, %v1853_v45 }
0x1930   :  { %v1127_v3 = vadd.f32 %v1126_v54, %v1121_v55 }
0x1932   :  { %v1130_v48 = vpop.permute.xlu1 %1129 }
0x1933   :  { %v1132_v56 = vmul.f32 %v1130_v48, %v1869_v6 }
0x1935   :  { %v1133_v60 = vadd.f32 %v1132_v56, %v1127_v3 }
0x1937   :  { %v1136_v52 = vpop.permute.xlu1 %1135 }
0x1938   :  { %v1138_v57 = vmul.f32 %v1136_v52, %v1885_v26 }
0x193a   :  { %v1139_v61 = vadd.f32 %v1138_v57, %v1133_v60 }
0x193c   :  { %v1142_v58 = vpop.permute.xlu1 %1141 }
0x193d   :  { %v1144_v10 = vmul.f32 %v1142_v58, %v1897_v46 }
0x193f   :  { %v1145_v13 = vadd.f32 %v1144_v10, %v1139_v61 }
0x1941   :  { %v1148_v59 = vpop.permute.xlu1 %1147 }
0x1942   :  { %v1150_v34 = vmul.f32 %v1148_v59, %v1922_v14 }
0x1944   :  { %v1151_v25 = vadd.f32 %v1150_v34, %v1145_v13 }
0x1946   :  { %1164 = vrot.lane.b32.xlu1 %v1151_v25, %s1642_s15 }
0x19b8   :  { %v1165_v0 = vpop.permute.xlu1 %1164 }
0x19b9   :  { %1477 = vmatmul.mubr.msk.f32.vlgmr.msra.gmra.mrb[10].mxu1 %vm194_vm3, %v1165_v0 }
0x19ba   :  { %1625 = shalt.err (!%p1622_p4)
}
0x19bb   :  { %s1626_s23 = scalar_lea.hbm %s1985_s11, 128 }
0x19bc   :  { %p1627_p5 = scmp.ne.s32.totalorder %s1985_s11, %s1626_s23  ;;  %p1630_p6 = scmp.lt.u32.totalorder %s1626_s23, %s1985_s11 }
0x19be   :  { %p1632_p7 = pnand %p1630_p6, %p1627_p5 }
0x19c0   :  { %1635 = shalt.err (!%p1632_p7)
}
0x19c1   :  { %1251 = dma.vmem_to_hbm [thread:$0]  %s1249_s19, 128, %s1985_s11, [#allocation3]   ;;  %v1294_v45 = vld [vmem:[%s1983_s9] ss:$0 sm:$0xff]  ;;  %vm1238_vm5 = vcmask 23552  }
0x1a8c   :  { %v1234_v6 = vpop.f32.mrb[10].mxu1 }
0x1a8d   :  { %v1235_v26 = vadd.f32 %v1294_v45, %v1234_v6  ;;  %v1478_v46 = vpop.f32.mrb[11].mxu1 }
0x1a8f   :  { %1239 = vst.msk [vmem:[%s1984_s10] sm:$0xff] %vm1238_vm5, %v1235_v26 }
0x1a90   :  { %1636 = dma.done.wait [#allocation3], 128  }
0x1a91   :  { %1637 = vsyncadd [#allocation3], 4294967168 }
0x1a92   :  { %1257 = vsyncpa [#allocation3], 1 }

</bundles_post_ra>
